<compile_context>
chip_gen: v6e
topology: v6e:2x2x1
jax: 0.10.0
libtpu: 0.0.40
codegen_flags: <defaults>
</compile_context>

<pallas_src>
import functools

import jax
import jax.numpy as jnp
from jax.experimental import pallas as pl
from jax.experimental.pallas import tpu as pltpu

THRESHOLD = 0.1
EPS = 1e-10


def _hecto_jumprelu_kernel(x_ref, o_ref, *, threshold, eps):
    x = x_ref[...]
    # Keep `jumped` in the input dtype so no tile-sized f32 copy is live
    # across the row reduction (matters for bf16 I/O; no-op for f32 I/O).
    zero = jnp.zeros((), dtype=x.dtype)
    jumped = jnp.where(x >= threshold, x, zero) + jnp.asarray(eps, dtype=x.dtype)
    # Per-row sum over the feature (lane) axis, accumulated in f32.
    denom = jnp.sum(jumped, axis=-1, keepdims=True, dtype=jnp.float32)
    # Fuse the hecto scale into the per-row reciprocal: a single broadcast
    # multiply over the tile.  Exact reciprocal to keep row sums within 1e-4.
    scale = 100.0 * pl.reciprocal(denom, approx=False)
    o_ref[...] = (jumped * scale).astype(o_ref.dtype)


def _round_up(n, m):
    return ((n + m - 1) // m) * m


def _target_tile_bytes():
    # Generation-aware tile budget: v5e/v6e (128 MiB physical VMEM) can afford
    # ~8 MiB input tiles; v7x (64 MiB) stays at 4 MiB so double-buffered
    # in + out plus compiler scratch fits comfortably.
    try:
        vmem_bytes = pltpu.get_tpu_info().vmem_capacity_bytes
    except Exception:
        vmem_bytes = 0
    if vmem_bytes >= 128 * 1024 * 1024:
        return 8 * 1024 * 1024
    return 4 * 1024 * 1024


def _vmem_limit_bytes(target_tile_bytes):
    return 64 * 1024 * 1024 if target_tile_bytes >= 8 * 1024 * 1024 else 48 * 1024 * 1024


def _choose_block_b(B, D, itemsize, sublane, target_tile_bytes, min_grid_steps=2):
    # Byte-budget cap only (no hard row cap), so small-D inputs still get
    # multi-MiB tiles and the kernel stays HBM-bandwidth-bound.
    bb = target_tile_bytes // max(1, D * itemsize)
    bb = max(sublane, (bb // sublane) * sublane)
    # Guarantee >= min_grid_steps grid steps whenever B is large enough to
    # split, so both v7x TensorCores get work via the "parallel" grid axis.
    per_split = _round_up(pl.cdiv(B, min_grid_steps), sublane)
    bb = min(bb, max(sublane, per_split))
    # Never tile beyond the sublane-rounded batch itself.
    bb = min(bb, _round_up(B, sublane))
    return max(sublane, bb)


def hecto_fixed_rescaled_jump_relu(x, threshold=THRESHOLD, eps=EPS, block_b=None):
    """x: (B, D) float array. Returns (B, D) with each row summing to ~100."""
    B, D = x.shape
    itemsize = jnp.dtype(x.dtype).itemsize
    # Sublane packing: 8 rows per vreg for 32-bit, 16 for 16-bit dtypes.
    sublane = 8 if itemsize >= 4 else 16

    target_tile_bytes = _target_tile_bytes()
    if block_b is None:
        block_b = _choose_block_b(B, D, itemsize, sublane, target_tile_bytes)
    else:
        block_b = max(sublane, (block_b // sublane) * sublane)
        block_b = min(block_b, _round_up(B, sublane))

    grid_b = pl.cdiv(B, block_b)

    # TODO(synk): if production D is not a multiple of 128, fold k=128//D rows
    # per lane-row in the wrapper (contiguous reshape, free) and do the row
    # reduce as a block-diagonal ones matmul on the idle MXU so stores become
    # lane-dense unmasked vst; left out here to keep the generic path simple.

    kernel = functools.partial(_hecto_jumprelu_kernel, threshold=threshold, eps=eps)

    return pl.pallas_call(
        kernel,
        out_shape=jax.ShapeDtypeStruct((B, D), x.dtype),
        grid_spec=pltpu.PrefetchScalarGridSpec(
            num_scalar_prefetch=0,
            grid=(grid_b,),
            in_specs=[pl.BlockSpec((block_b, D), lambda i: (i, 0))],
            out_specs=pl.BlockSpec((block_b, D), lambda i: (i, 0)),
        ),
        compiler_params=pltpu.CompilerParams(
            dimension_semantics=("parallel",),
            vmem_limit_bytes=_vmem_limit_bytes(target_tile_bytes),
        ),
    )(x)


def _reference(x, threshold=THRESHOLD, eps=EPS):
    mask = (x >= threshold).astype(x.dtype)
    jumped = x * mask
    jumped_plus_eps = jumped + eps
    normalized = jumped_plus_eps / jnp.sum(jumped_plus_eps, axis=1, keepdims=True)
    return normalized * 100.0


if __name__ == "__main__":
    key = jax.random.PRNGKey(0)

    # Small test consistent with the module: batch=8, hidden=32.
    B, D = 8, 32
    x = jax.random.normal(key, (B, D), dtype=jnp.float32)

    out = jax.block_until_ready(hecto_fixed_rescaled_jump_relu(x))
    ref = _reference(x)
    assert out.shape == (B, D)
    assert jnp.allclose(out, ref, rtol=1e-5, atol=1e-5), "mismatch vs reference"
    assert jnp.allclose(jnp.sum(out, axis=1), 100.0, rtol=1e-4, atol=1e-3)

    # Ragged batch: exercises the partial-boundary-block path (no pad/slice).
    B2, D2 = 13, 32
    x2 = jax.random.normal(jax.random.PRNGKey(1), (B2, D2), dtype=jnp.float32)
    out2 = jax.block_until_ready(hecto_fixed_rescaled_jump_relu(x2, block_b=8))
    ref2 = _reference(x2)
    assert out2.shape == (B2, D2)
    assert jnp.allclose(out2, ref2, rtol=1e-5, atol=1e-5), "ragged-batch mismatch"
    assert jnp.allclose(jnp.sum(out2, axis=1), 100.0, rtol=1e-4, atol=1e-3)

    # bf16 I/O path (f32 row-sum accumulation inside the kernel).
    B3, D3 = 32, 32
    x3 = jax.random.normal(jax.random.PRNGKey(2), (B3, D3), dtype=jnp.bfloat16)
    out3 = jax.block_until_ready(hecto_fixed_rescaled_jump_relu(x3))
    ref3 = _reference(x3.astype(jnp.float32))
    assert out3.shape == (B3, D3)
    assert jnp.allclose(out3.astype(jnp.float32), ref3, rtol=2e-2, atol=2e-2), (
        "bf16 mismatch vs reference"
    )

    print("KERNEL_OK")
</pallas_src>

<mosaic_0001>
module attributes {stable_mosaic.version = 11 : i64} {
  func.func @_hecto_jumprelu_kernel(%arg0: i32, %arg1: memref<8x32xf32, #tpu.memory_space<vmem>>, %arg2: memref<8x32xf32, #tpu.memory_space<vmem>>) attributes {dimension_semantics = [#tpu.dimension_semantics<parallel>], iteration_bounds = array<i64: 1>, scalar_prefetch = 0 : i64, scratch_operands = 0 : i64, tpu.core_type = #tpu.core_type<tc>, window_params = [{transform_indices = @transform_0, window_bounds = array<i64: 8, 32>}, {transform_indices = @transform_1, window_bounds = array<i64: 8, 32>}]} {
    %c0 = arith.constant 0 : index
    %c0_0 = arith.constant 0 : index
    %0 = vector.load %arg1[%c0, %c0_0] : memref<8x32xf32, #tpu.memory_space<vmem>>, vector<8x32xf32>
    %cst = arith.constant 1.000000e-01 : f32
    %1 = vector.broadcast %cst : f32 to vector<8x32xf32>
    %2 = arith.cmpf oge, %0, %1 : vector<8x32xf32>
    %cst_1 = arith.constant 0.000000e+00 : f32
    %3 = vector.broadcast %cst_1 : f32 to vector<8x32xf32>
    %4 = arith.select %2, %0, %3 : vector<8x32xi1>, vector<8x32xf32>
    %cst_2 = arith.constant 1.000000e-10 : f32
    %5 = vector.broadcast %cst_2 : f32 to vector<8x32xf32>
    %6 = arith.addf %4, %5 : vector<8x32xf32>
    %cst_3 = arith.constant dense<0.000000e+00> : vector<8xf32>
    %7 = vector.multi_reduction <add>, %6, %cst_3 [1] : vector<8x32xf32> to vector<8xf32>
    %8 = vector.shape_cast %7 : vector<8xf32> to vector<8x1xf32>
    %9 = tpu.reciprocal %8 : vector<8x1xf32> -> vector<8x1xf32>
    %cst_4 = arith.constant 1.000000e+02 : f32
    %10 = vector.broadcast %cst_4 : f32 to vector<8x1xf32>
    %11 = arith.mulf %10, %9 : vector<8x1xf32>
    %12 = vector.broadcast %11 : vector<8x1xf32> to vector<8x32xf32>
    %13 = arith.mulf %6, %12 : vector<8x32xf32>
    %c0_5 = arith.constant 0 : index
    %c0_6 = arith.constant 0 : index
    %14 = vector.load %arg2[%c0_5, %c0_6] : memref<8x32xf32, #tpu.memory_space<vmem>>, vector<8x32xf32>
    tpu.vector_store %arg2[%c0_5, %c0_6], %13 {strides = array<i32>} : memref<8x32xf32, #tpu.memory_space<vmem>>, vector<8x32xf32>,
    return
  }
  func.func @transform_0(%arg0: i32) -> (i32, i32) {
    %c0_i32 = arith.constant 0 : i32
    %c0_i32_0 = arith.constant 0 : i32
    return %arg0, %c0_i32 : i32, i32
  }
  func.func @transform_1(%arg0: i32) -> (i32, i32) {
    %c0_i32 = arith.constant 0 : i32
    %c0_i32_0 = arith.constant 0 : i32
    return %arg0, %c0_i32 : i32, i32
  }
}

</mosaic_0001>

<bundles_post_ra>
// kernel: tpu_custom_call.1
= control target key start
LH: loop header
LB: loop body
LE: loop exit
PB: predicated region body
PF: predicated region fallthrough
CT: control target
= control target key end

     0   :  { %6 = vsyncpa [#allocation3], 0  ;;  %s114_s0 = inlined_call_operand.hbm [shape: f32[8,32], index: 0, kind: input, shape index: {}]   ;;  %s115_s1 = inlined_call_operand.hbm [shape: f32[8,32], index: 1, kind: output, shape index: {}]  }
   0x1   :  { %7 = vsyncpa [#allocation4], 0  ;;  %s96_s6 = smov [#allocation2]  }
   0x2   :  { %s14_s7 = sshll.u32 %s96_s6, 4  ;;  %s15_s7 = int_to_ptr.vmem [resolvable:$true] %s14_s7 }
   0x3   :  { %s60_s8 = scalar_lea.vmem %s15_s7, 128  ;;  %p65_p1 = scmp.lt.s32.totalorder %s15_s7, %s15_s7 }
   0x4   :  { %p61_p0 = scmp.ne.s32.totalorder %s15_s7, %s60_s8  ;;  %p66_p2 = scmp.lt.s32.totalorder %s60_s8, %s60_s8 }
   0x6   :  { %p67_p3 = por %p66_p2, %p65_p1 }
   0x8   :  { %p68_p4 = pnand %p67_p3, %p61_p0 }
   0xa   :  { %71 = shalt.err (!%p68_p4)
}
   0xb   :  { %17 = dma.hbm_to_vmem [thread:$0]  %s114_s0, 128, %s15_s7, [#allocation3]  }
   0xc   :  { %92 = dma.done.wait [#allocation3], 128  }
   0xd   :  { %93 = vsyncadd [#allocation3], 4294967168  ;;  %v21_v0 = vld [vmem:[#allocation2] sm:$0xff]  ;;  %vm25_vm1 = vcmask 261120   ;;  %s97_s11 = smov [#allocation5]  }
   0xe   :  { %vm22_vm0 = vcmp.ge.f32.partialorder %v21_v0, 0.1  ;;  %s39_s12 = sshll.u32 %s97_s11, 4  ;;  %s40_s12 = int_to_ptr.vmem [resolvable:$true] %s39_s12 }
   0xf   :  { %v23_v1 = vsel %vm22_vm0, %v21_v0, 0.0  ;;  %s72_s13 = scalar_lea.vmem %s40_s12, 128  ;;  %p77_p6 = scmp.lt.s32.totalorder %s40_s12, %s40_s12 }
  0x10   :  { %v24_v2 = vadd.f32 1e-10, %v23_v1  ;;  %p73_p5 = scmp.ne.s32.totalorder %s40_s12, %s72_s13  ;;  %p78_p7 = scmp.lt.s32.totalorder %s72_s13, %s72_s13 }
  0x12   :  { %v26_v3 = vsel %vm25_vm1, %v24_v2, 0.0  ;;  %p79_p8 = por %p78_p7, %p77_p6 }
  0x13   :  { %27 = vadd.xlane.f32.xlu0 %v26_v3 }
  0x14   :  { %p80_p9 = pnand %p79_p8, %p73_p5 }
  0x9c   :  { %v28_v4 = vpop.xlane.xlu0 %27 }
  0x9d   :  { %50 = vrcp.f32 %v28_v4 }
  0xaa   :  { %v51_v5 = vpop.eup %50 }
  0xab   :  { %v30_v6 = vmul.f32 100.0, %v51_v5 }
  0xad   :  { %v31_v7 = vmul.f32 %v30_v6, %v24_v2 }
  0xaf   :  { %32 = vst.msk [vmem:[#allocation5] sm:$0xff] %vm25_vm1, %v31_v7 }
  0xb0   :  { %83 = shalt.err (!%p80_p9)
}
  0xb1   :  { %42 = dma.vmem_to_hbm [thread:$0]  %s40_s12, 128, %s115_s1, [#allocation4]  }
  0xb2   :  { %94 = dma.done.wait [#allocation4], 128  }
  0xb3   :  { %95 = vsyncadd [#allocation4], 4294967168 }
  0xb4   :  { %46 = vsyncpa [#allocation3], 1 }
  0xb5   :  { %47 = vsyncpa [#allocation4], 1 }

</bundles_post_ra>
